<compile_context>
chip_gen: v7x
topology: tpu7x:2x2x1
jax: 0.10.0
libtpu: 0.0.40
codegen_flags: <defaults>
</compile_context>

<pallas_src>
import functools

import jax
import jax.numpy as jnp
from jax import lax
from jax.experimental import pallas as pl
from jax.experimental.pallas import tpu as pltpu

_SQRT_2_OVER_PI = 0.7978845608028654


def _round_up(x, m):
    return (x + m - 1) // m * m


def _gelu_tanh(x):
    # TODO(synk): PyTorch nn.GELU() defaults to the exact erf form; the tanh
    # approximation (PyTorch approximate='tanh', max |err| ~1e-3) is used so
    # the transcendental is guaranteed to lower to the TPU EUP.
    return 0.5 * x * (1.0 + jnp.tanh(_SQRT_2_OVER_PI * (x + 0.044715 * x * x * x)))


def _pick_tk(c_hid, cap=512):
    """Hidden-dim tile: full dim if small, else a 128-multiple divisor <= cap."""
    if c_hid <= cap:
        return c_hid
    for t in range(cap, 127, -128):
        if c_hid % t == 0:
            return t
    return cap  # ragged tail handled by in-kernel masking


def _vmem_limit_bytes(tm, tk, c_in, c_out, x_itemsize, w_itemsize):
    try:
        cap = int(pltpu.get_tpu_info().vmem_capacity_bytes)
    except Exception:
        cap = 64 << 20  # conservative: v7x per-TC physical VMEM
    need = (2 * tm * c_in * x_itemsize        # x row tile (double buffered)
            + 2 * tm * c_out * x_itemsize     # out row tile
            + 2 * c_in * tk * w_itemsize      # fc1 weight slice
            + 2 * tk * c_out * w_itemsize     # fc2 weight slice
            + 2 * (tk + c_out) * 4            # biases (f32)
            + tm * c_out * 4)                 # f32 accumulator scratch
    limit = max(need + (4 << 20), 16 << 20)   # headroom for compiler scratch
    return int(min(limit, cap - (8 << 20)))   # never hand over all of VMEM


def _mlp_kernel(x_ref, w1_ref, b1_ref, w2_ref, b2_ref, o_ref, acc_ref,
                *, tk, c_hid, mask_hidden):
    # x_ref : (tm, Cin)    row tile of inputs
    # w1_ref: (Cin, tk)    fc1 weight slice, pre-transposed to (in, out)
    # b1_ref: (1, tk)      fc1 bias slice (f32)
    # w2_ref: (tk, Cout)   fc2 weight slice, pre-transposed to (in, out)
    # b2_ref: (1, Cout)    fc2 bias (f32)
    # o_ref : (tm, Cout)
    # acc_ref: (tm, Cout)  f32 accumulator, persistent across the k axis
    k = pl.program_id(1)

    @pl.when(k == 0)
    def _init():
        acc_ref[...] = jnp.zeros_like(acc_ref)

    h = jnp.dot(x_ref[...], w1_ref[...], preferred_element_type=jnp.float32)
    h = _gelu_tanh(h + b1_ref[...])                 # f32 VPU/EUP math
    if mask_hidden:
        # Last hidden tile may run past c_hid: zero the garbage columns so the
        # garbage rows of w2 contribute nothing to the accumulator.
        col = lax.broadcasted_iota(jnp.int32, h.shape, 1)
        h = jnp.where(k * tk + col < c_hid, h, 0.0)

    acc_ref[...] += jnp.dot(h.astype(w2_ref.dtype), w2_ref[...],
                            preferred_element_type=jnp.float32)

    @pl.when(k == pl.num_programs(1) - 1)
    def _finalize():
        o_ref[...] = (acc_ref[...] + b2_ref[...]).astype(o_ref.dtype)
    # Dropout (p=0.0 / eval) is an identity and is intentionally omitted.


def prepare_mlp_params(w1, b1, w2, b2):
    """One-time layout/dtype plumbing. Call OUTSIDE the jitted forward so no
    weight-transpose HBM pass runs per call."""
    w1_t = jnp.asarray(w1).T                                  # (Cin, Chid)
    w2_t = jnp.asarray(w2).T                                  # (Chid, Cout)
    b1_2 = jnp.asarray(b1).reshape(1, -1).astype(jnp.float32)  # (1, Chid)
    b2_2 = jnp.asarray(b2).reshape(1, -1).astype(jnp.float32)  # (1, Cout)
    return w1_t, b1_2, w2_t, b2_2


@jax.jit
def mlp_forward(x, w1_t, b1, w2_t, b2):
    """x: (..., Cin); w1_t: (Cin, Chid); b1: (1, Chid); w2_t: (Chid, Cout); b2: (1, Cout)."""
    *lead, c_in = x.shape
    c_hid = w1_t.shape[1]
    c_out = w2_t.shape[1]

    x2 = x.reshape(-1, c_in)
    m = x2.shape[0]

    # Balanced row tiles (cap 512); force >= 2 tiles so both v7x TCs get work.
    n_tiles = pl.cdiv(m, 512)
    tm = _round_up(pl.cdiv(m, n_tiles), 8)
    if pl.cdiv(m, tm) < 2 and m > 8:
        tm = _round_up(pl.cdiv(m, 2), 8)
    grid_m = pl.cdiv(m, tm)

    tk = _pick_tk(c_hid)
    grid_k = pl.cdiv(c_hid, tk)
    mask_hidden = (c_hid % tk) != 0

    vmem_limit = _vmem_limit_bytes(tm, tk, c_in, c_out,
                                   x2.dtype.itemsize, w1_t.dtype.itemsize)

    kernel = functools.partial(_mlp_kernel, tk=tk, c_hid=c_hid,
                               mask_hidden=mask_hidden)

    out = pl.pallas_call(
        kernel,
        out_shape=jax.ShapeDtypeStruct((m, c_out), x.dtype),
        grid_spec=pltpu.PrefetchScalarGridSpec(
            num_scalar_prefetch=0,
            grid=(grid_m, grid_k),
            in_specs=[
                pl.BlockSpec((tm, c_in), lambda i, k: (i, 0)),
                pl.BlockSpec((c_in, tk), lambda i, k: (0, k)),
                pl.BlockSpec((1, tk), lambda i, k: (0, k)),
                pl.BlockSpec((tk, c_out), lambda i, k: (k, 0)),
                pl.BlockSpec((1, c_out), lambda i, k: (0, 0)),
            ],
            out_specs=pl.BlockSpec((tm, c_out), lambda i, k: (i, 0)),
            scratch_shapes=[pltpu.VMEM((tm, c_out), jnp.float32)],
        ),
        compiler_params=pltpu.CompilerParams(
            dimension_semantics=("parallel", "arbitrary"),
            vmem_limit_bytes=vmem_limit,
        ),
    )(x2, w1_t, b1, w2_t, b2)

    return out.reshape(*lead, c_out)


def _reference(x, w1, b1, w2, b2):
    xf = x.astype(jnp.float32)
    h = xf @ w1.T.astype(jnp.float32) + b1.astype(jnp.float32)
    h = _gelu_tanh(h)
    return h @ w2.T.astype(jnp.float32) + b2.astype(jnp.float32)


if __name__ == "__main__":
    # Small shapes consistent with the module; N=61 deliberately exercises the
    # partial (masked) final row tile: M = 122 -> two 64-row tiles.
    B, N, C_IN, C_HID, C_OUT = 2, 61, 32, 64, 32

    key = jax.random.PRNGKey(0)
    kx, kw1, kb1, kw2, kb2 = jax.random.split(key, 5)

    x = jax.random.normal(kx, (B, N, C_IN), dtype=jnp.float32)
    s1 = 1.0 / (C_IN ** 0.5)
    s2 = 1.0 / (C_HID ** 0.5)
    # PyTorch nn.Linear-style uniform(-1/sqrt(fan_in), 1/sqrt(fan_in)) init.
    w1 = jax.random.uniform(kw1, (C_HID, C_IN), jnp.float32, -s1, s1)
    b1 = jax.random.uniform(kb1, (C_HID,), jnp.float32, -s1, s1)
    w2 = jax.random.uniform(kw2, (C_OUT, C_HID), jnp.float32, -s2, s2)
    b2 = jax.random.uniform(kb2, (C_OUT,), jnp.float32, -s2, s2)

    params = prepare_mlp_params(w1, b1, w2, b2)   # one-time, outside the jit
    out = mlp_forward(x, *params)
    out = jax.block_until_ready(out)

    ref = _reference(x, w1, b1, w2, b2)
    assert out.shape == (B, N, C_OUT)
    assert jnp.allclose(out, ref, rtol=1e-4, atol=1e-4), "mismatch vs reference"

    print("KERNEL_OK")
</pallas_src>

<mosaic_0001>
module attributes {stable_mosaic.version = 11 : i64} {
  func.func @_mlp_kernel(%arg0: i32, %arg1: i32, %arg2: memref<64x32xf32, #tpu.memory_space<vmem>>, %arg3: memref<32x64xf32, #tpu.memory_space<vmem>>, %arg4: memref<1x64xf32, #tpu.memory_space<vmem>>, %arg5: memref<64x32xf32, #tpu.memory_space<vmem>>, %arg6: memref<1x32xf32, #tpu.memory_space<vmem>>, %arg7: memref<64x32xf32, #tpu.memory_space<vmem>>, %arg8: memref<64x32xf32, #tpu.memory_space<vmem>>) attributes {dimension_semantics = [#tpu.dimension_semantics<parallel>, #tpu.dimension_semantics<arbitrary>], iteration_bounds = array<i64: 2, 1>, scalar_prefetch = 0 : i64, scratch_operands = 1 : i64, tpu.core_type = #tpu.core_type<tc>, window_params = [{transform_indices = @transform_0, window_bounds = array<i64: 64, 32>}, {transform_indices = @transform_1, window_bounds = array<i64: 32, 64>}, {transform_indices = @transform_2, window_bounds = array<i64: 1, 64>}, {transform_indices = @transform_3, window_bounds = array<i64: 64, 32>}, {pipeline_mode = #tpu.pipeline_mode<synchronous>, transform_indices = @transform_4, window_bounds = array<i64: 1, 32>}, {transform_indices = @transform_5, window_bounds = array<i64: 64, 32>}]} {
    %c0_i32 = arith.constant 0 : i32
    %0 = arith.cmpi eq, %arg1, %c0_i32 : i32
    %1 = arith.extui %0 : i1 to i32
    %c0_i32_0 = arith.constant 0 : i32
    %2 = arith.cmpi ne, %1, %c0_i32_0 : i32
    scf.if %2 {
      %cst_19 = arith.constant 0.000000e+00 : f32
      %30 = vector.broadcast %cst_19 : f32 to vector<64x32xf32>
      %c0_20 = arith.constant 0 : index
      %c0_21 = arith.constant 0 : index
      %31 = vector.load %arg8[%c0_20, %c0_21] : memref<64x32xf32, #tpu.memory_space<vmem>>, vector<64x32xf32>
      tpu.vector_store %arg8[%c0_20, %c0_21], %30 {strides = array<i32>} : memref<64x32xf32, #tpu.memory_space<vmem>>, vector<64x32xf32>,
    } else {
    }
    %c0 = arith.constant 0 : index
    %c0_1 = arith.constant 0 : index
    %3 = vector.load %arg2[%c0, %c0_1] : memref<64x32xf32, #tpu.memory_space<vmem>>, vector<64x32xf32>
    %c0_2 = arith.constant 0 : index
    %c0_3 = arith.constant 0 : index
    %4 = vector.load %arg3[%c0_2, %c0_3] : memref<32x64xf32, #tpu.memory_space<vmem>>, vector<32x64xf32>
    %cst = arith.constant dense<0.000000e+00> : vector<64x64xf32>
    %5 = tpu.matmul %3, %4, %cst {dimension_numbers = #tpu.dot_dimension_numbers<[1], [0], [0], [1], [0, 0, 1, 1], [], []>} : vector<64x32xf32>, vector<32x64xf32>, vector<64x64xf32> -> vector<64x64xf32>
    %c0_4 = arith.constant 0 : index
    %c0_5 = arith.constant 0 : index
    %6 = vector.load %arg4[%c0_4, %c0_5] : memref<1x64xf32, #tpu.memory_space<vmem>>, vector<1x64xf32>
    %7 = vector.broadcast %6 : vector<1x64xf32> to vector<64x64xf32>
    %8 = arith.addf %5, %7 : vector<64x64xf32>
    %cst_6 = arith.constant 5.000000e-01 : f32
    %9 = vector.broadcast %cst_6 : f32 to vector<64x64xf32>
    %10 = arith.mulf %9, %8 : vector<64x64xf32>
    %cst_7 = arith.constant 4.471500e-02 : f32
    %11 = vector.broadcast %cst_7 : f32 to vector<64x64xf32>
    %12 = arith.mulf %11, %8 : vector<64x64xf32>
    %13 = arith.mulf %12, %8 : vector<64x64xf32>
    %14 = arith.mulf %13, %8 : vector<64x64xf32>
    %15 = arith.addf %8, %14 : vector<64x64xf32>
    %cst_8 = arith.constant 0.797884583 : f32
    %16 = vector.broadcast %cst_8 : f32 to vector<64x64xf32>
    %17 = arith.mulf %16, %15 : vector<64x64xf32>
    %18 = math.tanh %17 : vector<64x64xf32>
    %cst_9 = arith.constant 1.000000e+00 : f32
    %19 = vector.broadcast %cst_9 : f32 to vector<64x64xf32>
    %20 = arith.addf %19, %18 : vector<64x64xf32>
    %21 = arith.mulf %10, %20 : vector<64x64xf32>
    %c0_10 = arith.constant 0 : index
    %c0_11 = arith.constant 0 : index
    %22 = vector.load %arg8[%c0_10, %c0_11] : memref<64x32xf32, #tpu.memory_space<vmem>>, vector<64x32xf32>
    %c0_12 = arith.constant 0 : index
    %c0_13 = arith.constant 0 : index
    %23 = vector.load %arg5[%c0_12, %c0_13] : memref<64x32xf32, #tpu.memory_space<vmem>>, vector<64x32xf32>
    %cst_14 = arith.constant dense<0.000000e+00> : vector<64x32xf32>
    %24 = tpu.matmul %21, %23, %cst_14 {dimension_numbers = #tpu.dot_dimension_numbers<[1], [0], [0], [1], [0, 0, 1, 1], [], []>} : vector<64x64xf32>, vector<64x32xf32>, vector<64x32xf32> -> vector<64x32xf32>
    %25 = arith.addf %22, %24 : vector<64x32xf32>
    %c0_15 = arith.constant 0 : index
    %c0_16 = arith.constant 0 : index
    %26 = vector.load %arg8[%c0_15, %c0_16] : memref<64x32xf32, #tpu.memory_space<vmem>>, vector<64x32xf32>
    tpu.vector_store %arg8[%c0_15, %c0_16], %25 {strides = array<i32>} : memref<64x32xf32, #tpu.memory_space<vmem>>, vector<64x32xf32>,
    %c0_i32_17 = arith.constant 0 : i32
    %27 = arith.cmpi eq, %arg1, %c0_i32_17 : i32
    %28 = arith.extui %27 : i1 to i32
    %c0_i32_18 = arith.constant 0 : i32
    %29 = arith.cmpi ne, %28, %c0_i32_18 : i32
    scf.if %29 {
      %c0_19 = arith.constant 0 : index
      %c0_20 = arith.constant 0 : index
      %30 = vector.load %arg8[%c0_19, %c0_20] : memref<64x32xf32, #tpu.memory_space<vmem>>, vector<64x32xf32>
      %c0_21 = arith.constant 0 : index
      %c0_22 = arith.constant 0 : index
      %31 = vector.load %arg6[%c0_21, %c0_22] : memref<1x32xf32, #tpu.memory_space<vmem>>, vector<1x32xf32>
      %32 = vector.broadcast %31 : vector<1x32xf32> to vector<64x32xf32>
      %33 = arith.addf %30, %32 : vector<64x32xf32>
      %c0_23 = arith.constant 0 : index
      %c0_24 = arith.constant 0 : index
      %34 = vector.load %arg7[%c0_23, %c0_24] : memref<64x32xf32, #tpu.memory_space<vmem>>, vector<64x32xf32>
      tpu.vector_store %arg7[%c0_23, %c0_24], %33 {strides = array<i32>} : memref<64x32xf32, #tpu.memory_space<vmem>>, vector<64x32xf32>,
    } else {
    }
    return
  }
  func.func @transform_0(%arg0: i32, %arg1: i32) -> (i32, i32) {
    %c0_i32 = arith.constant 0 : i32
    %c0_i32_0 = arith.constant 0 : i32
    return %arg0, %c0_i32 : i32, i32
  }
  func.func @transform_1(%arg0: i32, %arg1: i32) -> (i32, i32) {
    %c0_i32 = arith.constant 0 : i32
    %c0_i32_0 = arith.constant 0 : i32
    return %c0_i32, %arg1 : i32, i32
  }
  func.func @transform_2(%arg0: i32, %arg1: i32) -> (i32, i32) {
    %c0_i32 = arith.constant 0 : i32
    %c0_i32_0 = arith.constant 0 : i32
    return %c0_i32, %arg1 : i32, i32
  }
  func.func @transform_3(%arg0: i32, %arg1: i32) -> (i32, i32) {
    %c0_i32 = arith.constant 0 : i32
    %c0_i32_0 = arith.constant 0 : i32
    return %arg1, %c0_i32 : i32, i32
  }
  func.func @transform_4(%arg0: i32, %arg1: i32) -> (i32, i32) {
    %c0_i32 = arith.constant 0 : i32
    %c0_i32_0 = arith.constant 0 : i32
    %c0_i32_1 = arith.constant 0 : i32
    return %c0_i32, %c0_i32_0 : i32, i32
  }
  func.func @transform_5(%arg0: i32, %arg1: i32) -> (i32, i32) {
    %c0_i32 = arith.constant 0 : i32
    %c0_i32_0 = arith.constant 0 : i32
    return %arg0, %c0_i32 : i32, i32
  }
}

</mosaic_0001>

<bundles_post_ra>
// kernel: mlp_forward.1
= control target key start
LH: loop header
LB: loop body
LE: loop exit
PB: predicated region body
PF: predicated region fallthrough
CT: control target
= control target key end

     0   :  { %s1066_s18 = smov 0   ;;  %s1068_s19 = smov 0   ;;  %s1240_s0 = inlined_call_operand.vmem [shape: f32[122,32], index: 0, kind: input, shape index: {}]   ;;  %s1241_s1 = inlined_call_operand.vmem [shape: f32[32,64], index: 1, kind: input, shape index: {}]   ;;  %s1242_s2 = inlined_call_operand.vmem [shape: f32[1,64], index: 2, kind: input, shape index: {}]   ;;  %s1243_s3 = inlined_call_operand.vmem [shape: f32[64,32], index: 3, kind: input, shape index: {}]   ;;  %s1244_s4 = inlined_call_operand.vmem [shape: f32[1,32], index: 4, kind: input, shape index: {}]   ;;  %s1245_s5 = inlined_call_operand.vmem [shape: f32[122,32], index: 5, kind: output, shape index: {}]  }
   0x1   :  { %s1070_s20 = smov 0  }
   0x2 LB: > { %s27_s21 = sadd.s32 1, %s1029_s19  ;;  %p837_p0 = scmp.ge.s32.totalorder %s1033_s20, 1  ;;  %s1033_s20 = sphi %s1070_s20, %s15_s20   ;;  %s1029_s19 = sphi %s1068_s19, %s1247_s19   ;;  %s1025_s18 = sphi %s1066_s18, %s1246_s18  }
   0x3   : > { %p29_p1 = scmp.ge.s32.totalorder %s27_s21, 2  ;;  %p228_p2 = scmp.lt.s32.totalorder %s1033_s20, 3 }
   0x5   : > { %s1249_s21 = smov (%p29_p1, %s27_s21), 0  ;;  %p229_p3 = pnand %p837_p0, %p228_p2 }
   0x6   : > { %v314_v0 = vld [vmem:[%s1241_s1] sm:$0xff] (!%p229_p3)  ;;  %v315_v1 = vld [vmem:[%s1241_s1 + $0x8] sm:$0xff] (!%p229_p3)  ;;  %v316_v2 = vld [vmem:[%s1241_s1 + $0x10] sm:$0xff] (!%p229_p3)  ;;  %s838_s28 = sshll.u32 (!%p229_p3), %s1025_s18, 3  ;;  %vm297_vm0 = vcmask (!%p229_p3), 261120   ;;  %v1035_v26 = vmov (!%p229_p3), 0.0  }
   0x7   : > { %232 = sbr.rel (%p229_p3) target bundleno = 498 (0x1f2), region = 40  ;;  %v938_v3 = vpack.c.bf16 (!%p229_p3), %v315_v1, %v314_v0  ;;  %v317_v4 = vld [vmem:[%s1241_s1 + $0x18] sm:$0xff] (!%p229_p3)  ;;  %p269_p4 = scmp.lt.s32.totalorder (!%p229_p3), %s838_s28, 15  ;;  %v535_v14 = vld [vmem:[%s1243_s3] sm:$0xff] (!%p229_p3)  ;;  %v536_v15 = vld [vmem:[%s1243_s3 + $0x8] sm:$0xff] (!%p229_p3)  ;;  %299 = vst.msk [vmem:[#allocation2 + $0x8] sm:$0xff] (!%p229_p3), %vm297_vm0, %v1035_v26 }
   0x8   : > { %v942_v5 = vpack.c.bf16 (!%p229_p3), %v317_v4, %v316_v2  ;;  %v946_v16 = vpack.c.bf16 (!%p229_p3), %v536_v15, %v535_v14  ;;  %v537_v17 = vld [vmem:[%s1243_s3 + $0x10] sm:$0xff] (!%p229_p3)  ;;  %v538_v18 = vld [vmem:[%s1243_s3 + $0x18] sm:$0xff] (!%p229_p3)  ;;  %v539_v20 = vld [vmem:[%s1243_s3 + $0x20] sm:$0xff] (!%p229_p3)  ;;  %298 = vst.msk [vmem:[#allocation2] sm:$0xff] (!%p229_p3), %vm297_vm0, %v1035_v26  ;;  %vm543_vm1 = vcmask (!%p229_p3), 523264  }
   0x9   : > { %939 = vmatprep.subr.bf16.mxu0 (!%p229_p3), %v938_v3  ;;  %v950_v19 = vpack.c.bf16 (!%p229_p3), %v538_v18, %v537_v17  ;;  %v540_v21 = vld [vmem:[%s1243_s3 + $0x28] sm:$0xff] (!%p229_p3)  ;;  %v541_v23 = vld [vmem:[%s1243_s3 + $0x30] sm:$0xff] (!%p229_p3)  ;;  %v542_v24 = vld [vmem:[%s1243_s3 + $0x38] sm:$0xff] (!%p229_p3)  ;;  %300 = vst.msk [vmem:[#allocation2 + $0x10] sm:$0xff] (!%p229_p3), %vm297_vm0, %v1035_v26 }
   0xa   : > { %941 = vmatpush3.bf16.msra.mxu0 (!%p229_p3), %v938_v3  ;;  %962 = vmatprep.subr.bf16.mxu1 (!%p229_p3), %v946_v16  ;;  %v954_v22 = vpack.c.bf16 (!%p229_p3), %v540_v21, %v539_v20  ;;  %v958_v25 = vpack.c.bf16 (!%p229_p3), %v542_v24, %v541_v23  ;;  %301 = vst.msk [vmem:[#allocation2 + $0x18] sm:$0xff] (!%p229_p3), %vm297_vm0, %v1035_v26  ;;  %302 = vst.msk [vmem:[#allocation2 + $0x20] sm:$0xff] (!%p229_p3), %vm297_vm0, %v1035_v26  ;;  %v842_v27 = vld [vmem:[%s1242_s2] ss:$0 sm:$0xff] (!%p229_p3) }
   0xb   : > { %943 = vmatprep.subr.bf16.mxu0 (!%p229_p3), %v942_v5  ;;  %966 = vmatpush3.bf16.msra.mxu1 (!%p229_p3), %v946_v16  ;;  %303 = vst.msk [vmem:[#allocation2 + $0x28] sm:$0xff] (!%p229_p3), %vm297_vm0, %v1035_v26  ;;  %304 = vst.msk [vmem:[#allocation2 + $0x30] sm:$0xff] (!%p229_p3), %vm297_vm0, %v1035_v26 }
   0xc   : > { %963 = vmatprep.subr.bf16.mxu1 (!%p229_p3), %v950_v19  ;;  %305 = vst.msk [vmem:[#allocation2 + $0x38] sm:$0xff] (!%p229_p3), %vm297_vm0, %v1035_v26 }
   0xe   : > { %s1251_s28 = smov (!%p269_p4, %s838_s28), 15  ;;  %945 = vmatpush3.bf16.msra.mxu0 %v942_v5 }
   0xf   : > { %s839_s6 = sshll.u32 %s1251_s28, 3  ;;  %947 = vmatprep.subr.bf16.mxu0 %v946_v16  ;;  %967 = vmatpush3.bf16.msra.mxu1 %v950_v19 }
  0x10   : > { %s272_s9 = scalar_lea.vmem %s1240_s0, %s839_s6  ;;  %964 = vmatprep.subr.bf16.mxu1 %v954_v22  ;;  %s1209_s12 = scalar_lea.vmem %s1245_s5, %s839_s6 }
  0x11   : > { %v306_v6 = vld [vmem:[%s272_s9] sm:$0xff]  ;;  %v307_v7 = vld [vmem:[%s272_s9 + $0x8] sm:$0xff]  ;;  %v308_v8 = vld [vmem:[%s272_s9 + $0x10] sm:$0xff] }
  0x12   : > { %898 = vmatprep.mubr.msk.f32.mxu0 %vm297_vm0, %v306_v6  ;;  %v309_v9 = vld [vmem:[%s272_s9 + $0x18] sm:$0xff]  ;;  %v310_v10 = vld [vmem:[%s272_s9 + $0x20] sm:$0xff]  ;;  %v311_v11 = vld [vmem:[%s272_s9 + $0x28] sm:$0xff] }
  0x13   : > { %899 = vmatmul.mubr.msk.f32.vlgmr.msra.gmra.mrb[0].mxu0 %vm297_vm0, %v307_v7  ;;  %v312_v12 = vld [vmem:[%s272_s9 + $0x30] sm:$0xff]  ;;  %v313_v13 = vld [vmem:[%s272_s9 + $0x38] sm:$0xff]  ;;  %968 = vmatpush3.bf16.msra.mxu1 %v954_v22 }
  0x14   : > { %901 = vmatprep.mubr.msk.f32.mxu0 %vm297_vm0, %v308_v8  ;;  %949 = vmatpush3.bf16.msra.mxu0 %v946_v16 }
  0x15   : > { %951 = vmatprep.subr.bf16.mxu0 %v950_v19  ;;  %965 = vmatprep.subr.bf16.mxu1 %v958_v25 }
  0x17   : > { %902 = vmatmul.mubr.msk.f32.gmra.mrb[2].mxu0 %vm297_vm0, %v309_v9  ;;  %969 = vmatpush3.bf16.msra.mxu1 %v958_v25 }
  0x18   : > { %904 = vmatprep.mubr.msk.f32.mxu0 %vm297_vm0, %v310_v10  ;;  %953 = vmatpush3.bf16.msra.mxu0 %v950_v19 }
  0x19   : > { %955 = vmatprep.subr.bf16.mxu0 %v954_v22 }
  0x1b   : > { %905 = vmatmul.mubr.msk.f32.gmra.mrb[4].mxu0 %vm297_vm0, %v311_v11 }
  0x1c   : > { %907 = vmatprep.mubr.msk.f32.mxu0 %vm297_vm0, %v312_v12  ;;  %957 = vmatpush3.bf16.msra.mxu0 %v954_v22 }
  0x1d   : > { %959 = vmatprep.subr.bf16.mxu0 %v958_v25 }
  0x1f   : > { %908 = vmatmul.mubr.msk.f32.gmra.mrb[6].mxu0 %vm297_vm0, %v313_v13 }
  0x20   : > { %961 = vmatpush3.bf16.msra.mxu0 %v958_v25 }
  0xe6   : > { %v900_v28 = vpop.f32.mrb[0].mxu0 }
  0xe7   : > { %v1147_v29 = vadd.f32 %v900_v28, %v842_v27  ;;  %v416_v30 = vpop.f32.mrb[1].mxu0 }
  0xe8   : > { %v417_v31 = vadd.f32 %v842_v27, %v416_v30 }
  0xe9   : > { %v464_v32 = vmul.f32 0.044715, %v1147_v29  ;;  %v456_v25 = vmul.f32 0.5, %v1147_v29 }
  0xea   : > { %v463_v33 = vmul.f32 0.044715, %v417_v31  ;;  %v903_v34 = vpop.f32.mrb[2].mxu0  ;;  %v455_v23 = vmul.f32 0.5, %v417_v31 }
  0xeb   : > { %v472_v35 = vmul.f32 %v464_v32, %v1147_v29  ;;  %v1151_v36 = vadd.f32 %v903_v34, %v842_v27  ;;  %v426_v37 = vpop.f32.mrb[3].mxu0 }
  0xec   : > { %v471_v38 = vmul.f32 %v463_v33, %v417_v31  ;;  %v1153_v39 = vadd.f32 %v842_v27, %v426_v37 }
  0xed   : > { %v480_v40 = vmul.f32 %v472_v35, %v1147_v29  ;;  %v466_v41 = vmul.f32 0.044715, %v1151_v36 }
  0xee   : > { %v479_v42 = vmul.f32 %v471_v38, %v417_v31  ;;  %v465_v43 = vmul.f32 0.044715, %v1153_v39  ;;  %v906_v44 = vpop.f32.mrb[4].mxu0  ;;  %v457_v33 = vmul.f32 0.5, %v1153_v39 }
  0xef   : > { %v488_v45 = vadd.f32 %v480_v40, %v1147_v29  ;;  %v474_v46 = vmul.f32 %v466_v41, %v1151_v36  ;;  %v1160_v47 = vadd.f32 %v906_v44, %v842_v27  ;;  %v436_v48 = vpop.f32.mrb[5].mxu0 }
  0xf0   : > { %v487_v49 = vadd.f32 %v479_v42, %v417_v31  ;;  %v1162_v50 = vadd.f32 %v842_v27, %v436_v48  ;;  %v473_v51 = vmul.f32 %v465_v43, %v1153_v39  ;;  %v458_v31 = vmul.f32 0.5, %v1151_v36 }
  0xf1   : > { %v496_v52 = vmul.f32 0.7978846, %v488_v45  ;;  %v482_v53 = vmul.f32 %v474_v46, %v1151_v36  ;;  %v468_v54 = vmul.f32 0.044715, %v1160_v47  ;;  %v460_v43 = vmul.f32 0.5, %v1160_v47 }
  0xf2   : > { %v467_v55 = vmul.f32 0.044715, %v1162_v50  ;;  %v909_v56 = vpop.f32.mrb[6].mxu0  ;;  %v495_v57 = vmul.f32 0.7978846, %v487_v49  ;;  %v481_v58 = vmul.f32 %v473_v51, %v1153_v39  ;;  %v459_v41 = vmul.f32 0.5, %v1162_v50 }
  0xf3   : > { %995 = vtanh.f32 %v496_v52  ;;  %v490_v59 = vadd.f32 %v482_v53, %v1151_v36  ;;  %v476_v60 = vmul.f32 %v468_v54, %v1160_v47  ;;  %v1171_v61 = vadd.f32 %v909_v56, %v842_v27  ;;  %v446_v62 = vpop.f32.mrb[7].mxu0  ;;  %v527_v53 = vld [vmem:[#allocation2] sm:$0xff] }
  0xf4   : > { %v475_v63 = vmul.f32 %v467_v55, %v1162_v50  ;;  %v447_v0 = vadd.f32 %v842_v27, %v446_v62  ;;  %997 = vtanh.f32 %v495_v57  ;;  %v489_v1 = vadd.f32 %v481_v58, %v1153_v39  ;;  %v530_v58 = vld [vmem:[#allocation2 + $0x18] sm:$0xff] }
  0xf5   : > { %v484_v2 = vmul.f32 %v476_v60, %v1160_v47  ;;  %v470_v3 = vmul.f32 0.044715, %v1171_v61  ;;  %v498_v4 = vmul.f32 0.7978846, %v490_v59  ;;  %v462_v51 = vmul.f32 0.5, %v1171_v61  ;;  %v529_v59 = vld [vmem:[#allocation2 + $0x10] sm:$0xff] }
  0xf6   : > { %v483_v5 = vmul.f32 %v475_v63, %v1162_v50  ;;  %v469_v6 = vmul.f32 0.044715, %v447_v0  ;;  %v497_v7 = vmul.f32 0.7978846, %v489_v1  ;;  %v461_v36 = vmul.f32 0.5, %v447_v0  ;;  %v531_v1 = vld [vmem:[#allocation2 + $0x20] sm:$0xff] }
  0xf7   : > { %v492_v8 = vadd.f32 %v484_v2, %v1160_v47  ;;  %v478_v9 = vmul.f32 %v470_v3, %v1171_v61  ;;  %999 = vtanh.f32 %v498_v4  ;;  %v528_v47 = vld [vmem:[#allocation2 + $0x8] sm:$0xff]  ;;  %v859_v2 = vld [vmem:[%s1244_s4] ss:$0 sm:$0xff] }
  0xf8   : > { %v491_v10 = vadd.f32 %v483_v5, %v1162_v50  ;;  %v477_v11 = vmul.f32 %v469_v6, %v447_v0  ;;  %1001 = vtanh.f32 %v497_v7 }
  0xf9   : > { %v486_v12 = vmul.f32 %v478_v9, %v1171_v61  ;;  %v500_v13 = vmul.f32 0.7978846, %v492_v8  ;;  %v534_v8 = vld [vmem:[#allocation2 + $0x38] sm:$0xff] }
  0xfa   : > { %v485_v14 = vmul.f32 %v477_v11, %v447_v0  ;;  %v499_v15 = vmul.f32 0.7978846, %v491_v10  ;;  %v533_v11 = vld [vmem:[#allocation2 + $0x30] sm:$0xff] }
  0xfb   : > { %v494_v16 = vadd.f32 %v486_v12, %v1171_v61  ;;  %1003 = vtanh.f32 %v500_v13 }
  0xfc   : > { %v493_v17 = vadd.f32 %v485_v14, %v447_v0  ;;  %1005 = vtanh.f32 %v499_v15  ;;  %v532_v0 = vld [vmem:[#allocation2 + $0x28] sm:$0xff] }
  0xfd   : > { %v996_v18 = vpop.eup %995  ;;  %v502_v19 = vmul.f32 0.7978846, %v494_v16 }
  0xfe   : > { %v998_v20 = vpop.eup %997  ;;  %v512_v21 = vadd.f32 1.0, %v996_v18  ;;  %v501_v22 = vmul.f32 0.7978846, %v493_v17 }
  0xff   : > { %v511_v24 = vadd.f32 1.0, %v998_v20  ;;  %1007 = vtanh.f32 %v502_v19 }
 0x100   : > { %1009 = vtanh.f32 %v501_v22  ;;  %v520_v30 = vmul.f32 %v512_v21, %v456_v25 }
 0x101   : > { %v1000_v26 = vpop.eup %999  ;;  %v519_v27 = vmul.f32 %v511_v24, %v455_v23 }
 0x102   : > { %v1002_v28 = vpop.eup %1001  ;;  %v514_v32 = vadd.f32 1.0, %v1000_v26 }
 0x103   : > { %926 = vmatprep.mubr.msk.f32.mxu0 %vm543_vm1, %v519_v27  ;;  %v513_v34 = vadd.f32 1.0, %v1002_v28 }
 0x104   : > { %927 = vmatmul.mubr.msk.f32.vlgmr.msra.gmra.mrb[8].mxu0 %vm543_vm1, %v520_v30  ;;  %v522_v29 = vmul.f32 %v514_v32, %v458_v31 }
 0x105   : > { %v1004_v35 = vpop.eup %1003  ;;  %v521_v37 = vmul.f32 %v513_v34, %v457_v33 }
 0x106   : > { %v1006_v38 = vpop.eup %1005  ;;  %v516_v40 = vadd.f32 1.0, %v1004_v35 }
 0x107   : > { %929 = vmatprep.mubr.msk.f32.mxu1 %vm543_vm1, %v521_v37  ;;  %v515_v42 = vadd.f32 1.0, %v1006_v38 }
 0x108   : > { %930 = vmatmul.mubr.msk.f32.vlgmr.msra.gmra.mrb[0].mxu1 %vm543_vm1, %v522_v29  ;;  %v524_v46 = vmul.f32 %v516_v40, %v460_v43 }
 0x109   : > { %v1008_v39 = vpop.eup %1007  ;;  %v523_v44 = vmul.f32 %v515_v42, %v459_v41 }
 0x10a   : > { %v1010_v45 = vpop.eup %1009  ;;  %v518_v48 = vadd.f32 1.0, %v1008_v39 }
 0x10b   : > { %932 = vmatprep.mubr.msk.f32.mxu1 %vm543_vm1, %v523_v44  ;;  %v517_v49 = vadd.f32 1.0, %v1010_v45 }
 0x10c   : > { %933 = vmatmul.mubr.msk.f32.gmra.mrb[2].mxu1 %vm543_vm1, %v524_v46  ;;  %v526_v50 = vmul.f32 %v518_v48, %v462_v51 }
 0x10d   : > { %v525_v52 = vmul.f32 %v517_v49, %v461_v36 }
 0x10f   : > { %935 = vmatprep.mubr.msk.f32.mxu1 %vm543_vm1, %v525_v52 }
 0x110   : > { %936 = vmatmul.mubr.msk.f32.gmra.mrb[4].mxu1 %vm543_vm1, %v526_v50 }
 0x1d7   : > { %v928_v54 = vpop.f32.mrb[8].mxu0 }
 0x1d8   : > { %v674_v55 = vadd.f32 %v928_v54, %v528_v47  ;;  %v634_v56 = vpop.f32.mrb[9].mxu0 }
 0x1d9   : > { %v673_v57 = vadd.f32 %v634_v56, %v527_v53 }
 0x1da   : > { %682 = vst.msk [vmem:[#allocation2 + $0x8] sm:$0xff] %vm297_vm0, %v674_v55 }
 0x1db   : > { %681 = vst.msk [vmem:[#allocation2] sm:$0xff] %vm297_vm0, %v673_v57  ;;  %v931_v60 = vpop.f32.mrb[0].mxu1 }
 0x1dc   : > { %v676_v61 = vadd.f32 %v931_v60, %v530_v58  ;;  %v644_v62 = vpop.f32.mrb[1].mxu1 }
 0x1dd   : > { %v675_v63 = vadd.f32 %v644_v62, %v529_v59 }
 0x1de   : > { %684 = vst.msk [vmem:[#allocation2 + $0x18] sm:$0xff] %vm297_vm0, %v676_v61 }
 0x1df   : > { %683 = vst.msk [vmem:[#allocation2 + $0x10] sm:$0xff] %vm297_vm0, %v675_v63  ;;  %v934_v3 = vpop.f32.mrb[2].mxu1 }
 0x1e0   : > { %v678_v4 = vadd.f32 %v934_v3, %v532_v0  ;;  %v654_v5 = vpop.f32.mrb[3].mxu1 }
 0x1e1   : > { %v693_v6 = vld [vmem:[#allocation2 + $0x8] sm:$0xff]  ;;  %v677_v7 = vadd.f32 %v654_v5, %v531_v1 }
 0x1e2   : > { %v708_v9 = vadd.f32 %v859_v2, %v693_v6  ;;  %v692_v10 = vld [vmem:[#allocation2] sm:$0xff]  ;;  %686 = vst.msk [vmem:[#allocation2 + $0x28] sm:$0xff] %vm297_vm0, %v678_v4 }
 0x1e3   : > { %v707_v12 = vadd.f32 %v859_v2, %v692_v10  ;;  %685 = vst.msk [vmem:[#allocation2 + $0x20] sm:$0xff] %vm297_vm0, %v677_v7  ;;  %v937_v13 = vpop.f32.mrb[4].mxu1 }
 0x1e4   : > { %716 = vst.msk [vmem:[%s1209_s12 + $0x8] sm:$0xff] %vm297_vm0, %v708_v9  ;;  %v680_v14 = vadd.f32 %v937_v13, %v534_v8  ;;  %v664_v15 = vpop.f32.mrb[5].mxu1 }
 0x1e5   : > { %715 = vst.msk [vmem:[%s1209_s12] sm:$0xff] %vm297_vm0, %v707_v12  ;;  %v695_v16 = vld [vmem:[#allocation2 + $0x18] sm:$0xff]  ;;  %v679_v17 = vadd.f32 %v664_v15, %v533_v11 }
 0x1e6   : > { %v710_v18 = vadd.f32 %v859_v2, %v695_v16  ;;  %v694_v19 = vld [vmem:[#allocation2 + $0x10] sm:$0xff]  ;;  %688 = vst.msk [vmem:[#allocation2 + $0x38] sm:$0xff] %vm297_vm0, %v680_v14 }
 0x1e7   : > { %v709_v20 = vadd.f32 %v859_v2, %v694_v19  ;;  %687 = vst.msk [vmem:[#allocation2 + $0x30] sm:$0xff] %vm297_vm0, %v679_v17 }
 0x1e8   : > { %718 = vst.msk [vmem:[%s1209_s12 + $0x18] sm:$0xff] %vm297_vm0, %v710_v18 }
 0x1e9   : > { %717 = vst.msk [vmem:[%s1209_s12 + $0x10] sm:$0xff] %vm297_vm0, %v709_v20  ;;  %v697_v21 = vld [vmem:[#allocation2 + $0x28] sm:$0xff] }
 0x1ea   : > { %v712_v22 = vadd.f32 %v859_v2, %v697_v21  ;;  %v696_v23 = vld [vmem:[#allocation2 + $0x20] sm:$0xff] }
 0x1eb   : > { %v711_v24 = vadd.f32 %v859_v2, %v696_v23 }
 0x1ec   : > { %720 = vst.msk [vmem:[%s1209_s12 + $0x28] sm:$0xff] %vm297_vm0, %v712_v22 }
 0x1ed   : > { %719 = vst.msk [vmem:[%s1209_s12 + $0x20] sm:$0xff] %vm297_vm0, %v711_v24  ;;  %v699_v25 = vld [vmem:[#allocation2 + $0x38] sm:$0xff] }
 0x1ee   : > { %v714_v26 = vadd.f32 %v859_v2, %v699_v25  ;;  %v698_v27 = vld [vmem:[#allocation2 + $0x30] sm:$0xff] }
 0x1ef   : > { %v713_v28 = vadd.f32 %v859_v2, %v698_v27 }
 0x1f0   : > { %722 = vst.msk [vmem:[%s1209_s12 + $0x38] sm:$0xff] %vm297_vm0, %v714_v26 }
 0x1f1   : > { %721 = vst.msk [vmem:[%s1209_s12 + $0x30] sm:$0xff] %vm297_vm0, %v713_v28 }
 0x1f2 PF: > { %s15_s20 = sadd.s32 1, %s1033_s20   ;;  %s1246_s18 = smov %s1029_s19 }
 0x1f3   : > { %p12_p5 = scmp.ge.s32.totalorder %s15_s20, 4   ;;  %s1247_s19 = smov %s1249_s21 }
 0x1f5   :  { %14 = sbr.rel (!%p12_p5) target bundleno = 2 (0x2), region = 87 }

</bundles_post_ra>
